<compile_context>
chip_gen: v7x
topology: tpu7x:2x2x1
jax: 0.10.0
libtpu: 0.0.40
codegen_flags: <defaults>
</compile_context>

<pallas_src>
import functools

import jax
import jax.numpy as jnp
from jax.experimental import pallas as pl
from jax.experimental.pallas import tpu as pltpu


# ---------------------------------------------------------------------------
# Pass A kernel: per-(B-block, C) mean over L, then excitation MLP once.
# ---------------------------------------------------------------------------
def _se_reduce_kernel(x_ref, w1t_ref, w2t_ref, scale_ref, acc_ref, *, inv_len):
    li = pl.program_id(1)  # L-tile index (innermost, "arbitrary" reduction axis)

    @pl.when(li == 0)
    def _():
        acc_ref[...] = jnp.zeros_like(acc_ref)

    # Accumulate the partial sum over this L tile in f32 (only the reduction
    # is upcast; the streamed tile itself stays in native dtype elsewhere).
    acc_ref[...] += jnp.sum(x_ref[...].astype(jnp.float32), axis=-1)  # (1, C)

    @pl.when(li == pl.num_programs(1) - 1)
    def _():
        y = acc_ref[...] * inv_len                              # (1, C) mean
        # Weights are pre-transposed in the wrapper -> clean (K, N) operands,
        # no in-kernel XLU transpose.
        h = jnp.dot(y, w1t_ref[...].astype(jnp.float32),
                    preferred_element_type=jnp.float32)          # (1, C//r)
        h = jnp.maximum(h, 0.0)
        s = jnp.dot(h, w2t_ref[...].astype(jnp.float32),
                    preferred_element_type=jnp.float32)          # (1, C)
        s = jax.nn.sigmoid(s)
        scale_ref[...] = s[:, :, None].astype(scale_ref.dtype)   # (1, C, 1)


# ---------------------------------------------------------------------------
# Pass B kernel: out = x * scale, streamed with lane-dense (L-major) tiles.
# ---------------------------------------------------------------------------
def _se_scale_kernel(x_ref, s_ref, o_ref):
    x = x_ref[...]                          # (1, C, L_tile), native dtype
    s = s_ref[...].astype(x.dtype)          # (1, C, 1)
    o_ref[...] = x * s


def _choose_l_tile(length, max_tile=2048):
    """Largest multiple of 128 that divides `length` (capped); else full L."""
    if length % 128 != 0:
        return length
    t = min((max_tile // 128) * 128, length)
    while length % t != 0:
        t -= 128
    return t


def se_layer(x, w1, w2, *, l_tile=None, vmem_limit_bytes=48 * 1024 * 1024):
    """SELayer forward.  x: (B, C, L); w1: (C//r, C); w2: (C, C//r)."""
    B, C, L = x.shape
    Cr = w1.shape[0]
    assert w1.shape == (Cr, C) and w2.shape == (C, Cr)

    if l_tile is None:
        l_tile = _choose_l_tile(L)
    assert L % l_tile == 0, "L tile must divide L"
    num_l = L // l_tile
    itemsize = x.dtype.itemsize

    # Pre-transpose the weights once (XLA, outside the kernel).
    w1t = w1.T  # (C, C//r)
    w2t = w2.T  # (C//r, C)

    # ---------------- Pass A: per-(B, C) scale ---------------------------
    scale = pl.pallas_call(
        functools.partial(_se_reduce_kernel, inv_len=1.0 / L),
        out_shape=jax.ShapeDtypeStruct((B, C, 1), jnp.float32),
        grid_spec=pltpu.PrefetchScalarGridSpec(
            num_scalar_prefetch=0,
            grid=(B, num_l),
            in_specs=[
                pl.BlockSpec((1, C, l_tile), lambda b, l: (b, 0, l)),
                pl.BlockSpec((C, Cr), lambda b, l: (0, 0)),
                pl.BlockSpec((Cr, C), lambda b, l: (0, 0)),
            ],
            out_specs=pl.BlockSpec((1, C, 1), lambda b, l: (b, 0, 0)),
            scratch_shapes=[pltpu.VMEM((1, C), jnp.float32)],
        ),
        compiler_params=pltpu.CompilerParams(
            dimension_semantics=("parallel", "arbitrary"),
            vmem_limit_bytes=vmem_limit_bytes,
        ),
        cost_estimate=pl.CostEstimate(
            flops=B * C * L + 4 * B * C * Cr,
            transcendentals=B * C,
            bytes_accessed=B * C * L * itemsize + (2 * C * Cr + B * C) * 4,
        ),
    )(x, w1t, w2t)

    # ---------------- Pass B: streaming scale -----------------------------
    out = pl.pallas_call(
        _se_scale_kernel,
        out_shape=jax.ShapeDtypeStruct((B, C, L), x.dtype),
        grid_spec=pltpu.PrefetchScalarGridSpec(
            num_scalar_prefetch=0,
            grid=(B, num_l),
            in_specs=[
                pl.BlockSpec((1, C, l_tile), lambda b, l: (b, 0, l)),
                pl.BlockSpec((1, C, 1), lambda b, l: (b, 0, 0)),
            ],
            out_specs=pl.BlockSpec((1, C, l_tile), lambda b, l: (b, 0, l)),
        ),
        compiler_params=pltpu.CompilerParams(
            dimension_semantics=("parallel", "parallel"),
            vmem_limit_bytes=vmem_limit_bytes,
        ),
        cost_estimate=pl.CostEstimate(
            flops=B * C * L,
            transcendentals=0,
            bytes_accessed=2 * B * C * L * itemsize + B * C * 4,
        ),
    )(x, scale)
    return out


def se_layer_ref(x, w1, w2):
    # Pure-JAX reference mirroring the PyTorch forward.
    y = jnp.mean(x, axis=-1)                      # (B, C)
    h = jnp.maximum(y @ w1.T, 0.0)                # (B, C//r)
    s = jax.nn.sigmoid(h @ w2.T)                  # (B, C)
    return x * s[:, :, None]


if __name__ == "__main__":
    B, C, L = 2, 16, 512
    reduction = 2
    Cr = C // reduction
    key = jax.random.PRNGKey(0)
    kx, k1, k2 = jax.random.split(key, 3)

    x = jax.random.normal(kx, (B, C, L), dtype=jnp.float32)
    # Deterministic Kaiming-uniform-like init for the two bias-free Linears.
    bound1 = 1.0 / (C ** 0.5)
    bound2 = 1.0 / (Cr ** 0.5)
    w1 = jax.random.uniform(k1, (Cr, C), jnp.float32, -bound1, bound1)
    w2 = jax.random.uniform(k2, (C, Cr), jnp.float32, -bound2, bound2)

    # l_tile=128 -> 4 L tiles: exercises the gridded accumulate + finalize.
    out = se_layer(x, w1, w2, l_tile=128)
    out = jax.block_until_ready(out)

    ref = se_layer_ref(x, w1, w2)
    assert out.shape == (B, C, L)
    assert jnp.allclose(out, ref, atol=1e-5, rtol=1e-5)
    print("KERNEL_OK")
</pallas_src>

<mosaic_0001>
module attributes {stable_mosaic.version = 11 : i64} {
  func.func @_se_reduce_kernel(%arg0: i32, %arg1: i32, %arg2: memref<1x16x128xf32, #tpu.memory_space<vmem>>, %arg3: memref<16x8xf32, #tpu.memory_space<vmem>>, %arg4: memref<8x16xf32, #tpu.memory_space<vmem>>, %arg5: memref<1x16x1xf32, #tpu.memory_space<vmem>>, %arg6: memref<1x16xf32, #tpu.memory_space<vmem>>) attributes {dimension_semantics = [#tpu.dimension_semantics<parallel>, #tpu.dimension_semantics<arbitrary>], iteration_bounds = array<i64: 2, 4>, scalar_prefetch = 0 : i64, scratch_operands = 1 : i64, tpu.core_type = #tpu.core_type<tc>, window_params = [{transform_indices = @transform_0, window_bounds = array<i64: 1, 16, 128>}, {pipeline_mode = #tpu.pipeline_mode<synchronous>, transform_indices = @transform_1, window_bounds = array<i64: 16, 8>}, {pipeline_mode = #tpu.pipeline_mode<synchronous>, transform_indices = @transform_2, window_bounds = array<i64: 8, 16>}, {transform_indices = @transform_3, window_bounds = array<i64: 1, 16, 1>}]} {
    %c0_i32 = arith.constant 0 : i32
    %0 = arith.cmpi eq, %arg1, %c0_i32 : i32
    %1 = arith.extui %0 : i1 to i32
    %c0_i32_0 = arith.constant 0 : i32
    %2 = arith.cmpi ne, %1, %c0_i32_0 : i32
    scf.if %2 {
      %cst_8 = arith.constant 0.000000e+00 : f32
      %11 = vector.broadcast %cst_8 : f32 to vector<1x16xf32>
      %c0_9 = arith.constant 0 : index
      %c0_10 = arith.constant 0 : index
      %12 = vector.load %arg6[%c0_9, %c0_10] : memref<1x16xf32, #tpu.memory_space<vmem>>, vector<1x16xf32>
      tpu.vector_store %arg6[%c0_9, %c0_10], %11 {strides = array<i32>} : memref<1x16xf32, #tpu.memory_space<vmem>>, vector<1x16xf32>,
    } else {
    }
    %c0 = arith.constant 0 : index
    %c0_1 = arith.constant 0 : index
    %3 = vector.load %arg6[%c0, %c0_1] : memref<1x16xf32, #tpu.memory_space<vmem>>, vector<1x16xf32>
    %c0_2 = arith.constant 0 : index
    %c0_3 = arith.constant 0 : index
    %c0_4 = arith.constant 0 : index
    %4 = vector.load %arg2[%c0_2, %c0_3, %c0_4] : memref<1x16x128xf32, #tpu.memory_space<vmem>>, vector<1x16x128xf32>
    %cst = arith.constant dense<0.000000e+00> : vector<1x16xf32>
    %5 = vector.multi_reduction <add>, %4, %cst [2] : vector<1x16x128xf32> to vector<1x16xf32>
    %6 = arith.addf %3, %5 : vector<1x16xf32>
    %c0_5 = arith.constant 0 : index
    %c0_6 = arith.constant 0 : index
    %7 = vector.load %arg6[%c0_5, %c0_6] : memref<1x16xf32, #tpu.memory_space<vmem>>, vector<1x16xf32>
    tpu.vector_store %arg6[%c0_5, %c0_6], %6 {strides = array<i32>} : memref<1x16xf32, #tpu.memory_space<vmem>>, vector<1x16xf32>,
    %c3_i32 = arith.constant 3 : i32
    %8 = arith.cmpi eq, %arg1, %c3_i32 : i32
    %9 = arith.extui %8 : i1 to i32
    %c0_i32_7 = arith.constant 0 : i32
    %10 = arith.cmpi ne, %9, %c0_i32_7 : i32
    scf.if %10 {
      %c0_8 = arith.constant 0 : index
      %c0_9 = arith.constant 0 : index
      %11 = vector.load %arg6[%c0_8, %c0_9] : memref<1x16xf32, #tpu.memory_space<vmem>>, vector<1x16xf32>
      %cst_10 = arith.constant 0.001953125 : f32
      %12 = vector.broadcast %cst_10 : f32 to vector<1x16xf32>
      %13 = arith.mulf %11, %12 : vector<1x16xf32>
      %c0_11 = arith.constant 0 : index
      %c0_12 = arith.constant 0 : index
      %14 = vector.load %arg3[%c0_11, %c0_12] : memref<16x8xf32, #tpu.memory_space<vmem>>, vector<16x8xf32>
      %cst_13 = arith.constant dense<0.000000e+00> : vector<1x8xf32>
      %15 = tpu.matmul %13, %14, %cst_13 {dimension_numbers = #tpu.dot_dimension_numbers<[1], [0], [0], [1], [0, 0, 1, 1], [], []>} : vector<1x16xf32>, vector<16x8xf32>, vector<1x8xf32> -> vector<1x8xf32>
      %cst_14 = arith.constant 0.000000e+00 : f32
      %16 = vector.broadcast %cst_14 : f32 to vector<1x8xf32>
      %17 = arith.maximumf %15, %16 : vector<1x8xf32>
      %c0_15 = arith.constant 0 : index
      %c0_16 = arith.constant 0 : index
      %18 = vector.load %arg4[%c0_15, %c0_16] : memref<8x16xf32, #tpu.memory_space<vmem>>, vector<8x16xf32>
      %cst_17 = arith.constant dense<0.000000e+00> : vector<1x16xf32>
      %19 = tpu.matmul %17, %18, %cst_17 {dimension_numbers = #tpu.dot_dimension_numbers<[1], [0], [0], [1], [0, 0, 1, 1], [], []>} : vector<1x8xf32>, vector<8x16xf32>, vector<1x16xf32> -> vector<1x16xf32>
      %20 = arith.negf %19 : vector<1x16xf32>
      %21 = math.exp %20 : vector<1x16xf32>
      %cst_18 = arith.constant 1.000000e+00 : f32
      %22 = vector.broadcast %cst_18 : f32 to vector<1x16xf32>
      %23 = arith.addf %22, %21 : vector<1x16xf32>
      %24 = arith.divf %22, %23 : vector<1x16xf32>
      %25 = vector.shape_cast %24 : vector<1x16xf32> to vector<1x16x1xf32>
      %c0_19 = arith.constant 0 : index
      %c0_20 = arith.constant 0 : index
      %c0_21 = arith.constant 0 : index
      %26 = vector.load %arg5[%c0_19, %c0_20, %c0_21] : memref<1x16x1xf32, #tpu.memory_space<vmem>>, vector<1x16x1xf32>
      tpu.vector_store %arg5[%c0_19, %c0_20, %c0_21], %25 {strides = array<i32>} : memref<1x16x1xf32, #tpu.memory_space<vmem>>, vector<1x16x1xf32>,
    } else {
    }
    return
  }
  func.func @transform_0(%arg0: i32, %arg1: i32) -> (i32, i32, i32) {
    %c0_i32 = arith.constant 0 : i32
    %c0_i32_0 = arith.constant 0 : i32
    return %arg0, %c0_i32, %arg1 : i32, i32, i32
  }
  func.func @transform_1(%arg0: i32, %arg1: i32) -> (i32, i32) {
    %c0_i32 = arith.constant 0 : i32
    %c0_i32_0 = arith.constant 0 : i32
    %c0_i32_1 = arith.constant 0 : i32
    return %c0_i32, %c0_i32_0 : i32, i32
  }
  func.func @transform_2(%arg0: i32, %arg1: i32) -> (i32, i32) {
    %c0_i32 = arith.constant 0 : i32
    %c0_i32_0 = arith.constant 0 : i32
    %c0_i32_1 = arith.constant 0 : i32
    return %c0_i32, %c0_i32_0 : i32, i32
  }
  func.func @transform_3(%arg0: i32, %arg1: i32) -> (i32, i32, i32) {
    %c0_i32 = arith.constant 0 : i32
    %c0_i32_0 = arith.constant 0 : i32
    %c0_i32_1 = arith.constant 0 : i32
    return %arg0, %c0_i32, %c0_i32_0 : i32, i32, i32
  }
}

</mosaic_0001>

<bundles_post_ra>
// kernel: tpu_custom_call.1
= control target key start
LH: loop header
LB: loop body
LE: loop exit
PB: predicated region body
PF: predicated region fallthrough
CT: control target
= control target key end

     0   :  { %8 = vsyncpa [#allocation4], 0  ;;  %s1115_s0 = inlined_call_operand.hbm [shape: f32[2,16,512], index: 0, kind: input, shape index: {}]   ;;  %s1116_s1 = inlined_call_operand.vmem [shape: f32[16,8], index: 1, kind: input, shape index: {}]   ;;  %s1117_s2 = inlined_call_operand.vmem [shape: f32[8,16], index: 2, kind: input, shape index: {}]   ;;  %s1118_s3 = inlined_call_operand.vmem [shape: f32[2,16,1], index: 3, kind: output, shape index: {}]  }
   0x1   :  { %10 = vsyncpa [#allocation4 + $0x1], 0  ;;  %s931_s12 = smov 0   ;;  %s933_s13 = smov 0  }
   0x2   :  { %s935_s14 = smov 0   ;;  %s937_s15 = smov 0  }
   0x3   :  { %s939_s16 = smov 0   ;;  %s941_s17 = smov 0  }
   0x4   :  { %s943_s18 = smov 0   ;;  %s945_s19 = smov 0  }
   0x5 LB: > { %s678_s20 = sadd.s32 4294967295, %s899_s19   ;;  %s25_s21 = sadd.s32 1, %s891_s17  ;;  %s899_s19 = sphi %s945_s19, %s16_s19   ;;  %s895_s18 = sphi %s943_s18, %s1129_s18   ;;  %s891_s17 = sphi %s941_s17, %s1128_s17   ;;  %s887_s16 = sphi %s939_s16, %s1127_s16   ;;  %s883_s15 = sphi %s937_s15, %s1126_s15   ;;  %s879_s14 = sphi %s935_s14, %s1125_s14   ;;  %s875_s13 = sphi %s933_s13, %s1124_s13   ;;  %s871_s12 = sphi %s931_s12, %s1123_s12  }
   0x6   : > { %p26_p0 = scmp.ge.s32.totalorder %s25_s21, 4  ;;  %s28_s22 = sadd.s32 1, %s895_s18 }
   0x7   : > { %s37_s23 = sadd.s32 1, %s879_s14  ;;  %p44_p1 = scmp.ne.s32.totalorder %s879_s14, %s875_s13 }
   0x8   : > { %s1131_s21 = smov (%p26_p0, %s25_s21), 0  ;;  %s1133_s22 = smov (!%p26_p0, %s28_s22), %s895_s18 }
   0x9   : > { %s33_s24 = ssub.s32 %s891_s17, %s1131_s21  ;;  %p45_p2 = scmp.eq.s32.totalorder %s899_s19, 0 }
   0xa   : > { %p30_p3 = scmp.ge.s32.totalorder %s1133_s22, 2  ;;  %p50_p4 = scmp.ne.s32.totalorder %s875_s13, %s871_s12 }
   0xb   : > { %p982_p5 = por %p45_p2, %p44_p1  ;;  %p51_p6 = scmp.eq.s32.totalorder %s678_s20, 0 }
   0xc   : > { %s1135_s22 = smov (%p30_p3, %s1133_s22), 0  ;;  %p723_p8 = scmp.lt.s32.totalorder %s899_s19, 8 }
   0xd   : > { %p988_p7 = por %p51_p6, %p50_p4  ;;  %s32_s27 = ssub.s32 %s895_s18, %s1135_s22 }
   0xe   : > { %s34_s28 = sor.u32 %s33_s24, %s32_s27  ;;  %s148_s29 = sand.u32 1, %s879_s14  }
   0xf   : > { %p35_p9 = scmp.eq.s32.totalorder %s34_s28, 0  ;;  %s682_s30 = sshll.u32 %s148_s29, 4 }
  0x10   : > { %s683_s4 = sshll.u32 %s895_s18, 3  ;;  %s152_s8 = scalar_lea.vmem [#allocation3], %s682_s30 }
  0x11   : > { %s998_s5 = scalar_select %p35_p9, %s879_s14, %s37_s23  }
  0x12   : > { %s157_s6 = sadd.s32 %s891_s17, %s683_s4  ;;  %s160_s9 = sshll.u32 %s152_s8, 4  ;;  %s1006_s9 = int_to_ptr.vmem [resolvable:$true] %s160_s9 }
  0x13   : > { %s684_s7 = sshll.u32 %s157_s6, 7  ;;  %p1012_p10 = pnand %p723_p8, %p982_p5 }
  0x14   : > { %s1004_s12 = scalar_lea.hbm %s1115_s0, %s684_s7  ;;  %s1017_s23 = scalar_lea.sflag [#allocation4], %s148_s29 }
  0x15   : > { %s803_s24 = scalar_lea.hbm %s1004_s12, 256  ;;  %p805_p13 = pneg %p1012_p10 }
  0x16   : > { %p804_p12 = scmp.ne.s32.totalorder %s1004_s12, %s803_s24  ;;  %s808_s28 = scalar_lea.hbm %s1115_s0, 2048 }
  0x17   : > { %p809_p2 = scmp.lt.u32.totalorder %s1004_s12, %s1115_s0  ;;  %p810_p3 = scmp.lt.u32.totalorder %s808_s28, %s803_s24 }
  0x18   : > { %p806_p0 = pnand %p805_p13, %p804_p12  ;;  %p812_p5 = scmp.lt.u32.totalorder %s803_s24, %s1004_s12 }
  0x19   : > { %p811_p4 = por %p810_p3, %p809_p2 }
  0x1a   : > { %p807_p1 = pneg %p806_p0 }
  0x1b   : > { %p813_p6 = por %p812_p5, %p811_p4 }
  0x1d   : > { %p814_p8 = pnand %p813_p6, %p807_p1 }
  0x1f   : > { %817 = shalt.err (!%p814_p8)
}
  0x20   : > { %s818_s29 = scalar_lea.vmem %s1006_s9, 256  ;;  %s901_s6 = smov [#allocation3]  }
  0x21   : > { %p819_p9 = scmp.ne.s32.totalorder %s1006_s9, %s818_s29  ;;  %s823_s7 = sshll.u32 %s901_s6, 4  ;;  %s824_s7 = int_to_ptr.vmem [resolvable:$false] %s823_s7 }
  0x22   : > { %s825_s8 = scalar_lea.vmem %s824_s7, 512  ;;  %p826_p11 = scmp.lt.s32.totalorder %s1006_s9, %s824_s7 }
  0x23   : > { %p821_p12 = pnand %p819_p9, %p805_p13  ;;  %p827_p2 = scmp.lt.s32.totalorder %s825_s8, %s818_s29 }
  0x25   : > { %p822_p0 = pneg %p821_p12  ;;  %p828_p3 = por %p827_p2, %p826_p11 }
  0x27   : > { %p829_p4 = pnand %p828_p3, %p822_p0 }
  0x29   : > { %832 = shalt.err (!%p829_p4)
}
  0x2a   : > { %s902_s10 = smov 512   ;;  %s903_s11 = smov 128  }
  0x2b   : > { %s904_s24 = smov 8   ;;  %p168_p13 = scmp.lt.s32.totalorder %s899_s19, 9 }
  0x2c   : > { %722 = dma.hbm_to_vmem [thread:$0]  (!%p1012_p10), %s1004_s12, 256, %s1006_s9, %s1017_s23, %s902_s10, %s903_s11, %s904_s24  }
  0x2d   : > { %p1122_p1 = scmp.ge.s32.totalorder %s899_s19, 1 }
  0x2f   : > { %p169_p5 = pnand %p1122_p1, %p168_p13 }
  0x30   : > { %s174_s27 = sand.u32 (!%p169_p5), 1, %s875_s13  }
  0x31   : > { %172 = sbr.rel (%p169_p5) target bundleno = 949 (0x3b5), region = 32  ;;  %s686_s25 = sshll.u32 (!%p169_p5), %s174_s27, 4 }
  0x32   : > { %s175_s28 = scalar_lea.sflag (!%p169_p5), [#allocation4], %s174_s27  ;;  %s178_s30 = scalar_lea.vmem (!%p169_p5), [#allocation3], %s686_s25 }
  0x38   : > { %866 = dma.done.wait (%p988_p7), %s175_s28, 256  }
  0x39   : > { %868 = vsyncadd (%p988_p7), %s175_s28, 4294967040  ;;  %p201_p11 = scmp.lt.s32.totalorder %s887_s16, 1  ;;  %p689_p10 = scmp.ne.s32.totalorder %s883_s15, 0 }
  0x3a   : > { %vm210_vm0 = vcmask (!%p689_p10), 122880   ;;  %v905_v0 = vmov (!%p689_p10), 0.0  }
  0x3b   : > { %s1137_s16 = smov (!%p201_p11, %s887_s16), 1  ;;  %209 = sbr.rel (%p689_p10) target bundleno = 66 (0x42), region = 40 }
  0x3c   : > { %s696_s9 = sshll.u32 %s1137_s16, 4  ;;  %211 = vst.msk [vmem:[#allocation2] sm:$0x1] (!%p689_p10), %vm210_vm0, %v905_v0 }
  0x3d   : > { %s1058_s23 = scalar_lea.vmem %s1118_s3, %s696_s9 }
  0x42 PF: > { %v213_v1 = vld [vmem:[%s178_s30] sm:$0xff]  ;;  %v214_v2 = vld [vmem:[%s178_s30 + $0x8] sm:$0xff]  ;;  %v906_v3 = vmov 0   ;;  %v221_v4 = vlaneseq  ;;  %v907_v5 = vmov 1966171168   ;;  %vm400_vm1 = vcmask 130112  }
  0x43   : > { %215 = vadd.xlane.f32.xlu0 %v213_v1  ;;  %797 = vset.pattern.permute.xlu1 %v906_v3  ;;  %v290_v6 = vunpack.c.l.s4 %v907_v5  ;;  %vm418_vm2 = vcmask 122880   ;;  %p690_p7 = scmp.ne.s32.totalorder %s883_s15, 3 }
  0x44   : > { %798 = vset.pattern.permute.xlu0 %v906_v3  ;;  %v1061_v7 = vshrl.u32 %v221_v4, 7  ;;  %v390_v62 = vand.u32 127, %v221_v4  ;;  %v426_v4 = vld [vmem:[%s1116_s1] sm:$0xff] (!%p690_p7)  ;;  %vm909_vm3 = vmmov (!%p690_p7), 0   ;;  %vm428_vm4 = vcmask (!%p690_p7), 130048  }
  0x45   : > { %v291_v8 = vunpack.c.0.s8 %v290_v6  ;;  %vm504_vm5 = vcmask (!%p690_p7), 64512   ;;  %vm595_vm6 = vcmask (!%p690_p7), 7168  }
  0x46   : > { %v1064_v9 = vsub.s32 0, %v1061_v7  ;;  %v227_v10 = vsub.s32 1, %v1061_v7  ;;  %v231_v11 = vsub.s32 2, %v1061_v7  ;;  %v235_v12 = vsub.s32 3, %v1061_v7 }
  0x47   : > { %217 = vadd.xlane.f32.xlu0 %v214_v2  ;;  %v239_v13 = vsub.s32 4, %v1061_v7  ;;  %v243_v14 = vsub.s32 5, %v1061_v7  ;;  %v247_v15 = vsub.s32 6, %v1061_v7  ;;  %v251_v16 = vsub.s32 7, %v1061_v7 }
  0x48   : > { %v294_v18 = vsub.s32 %v291_v8, %v1061_v7  ;;  %v395_v63 = vadd.s32 4294967288, %v390_v62  ;;  %v393_v1 = vsub.s32 %v390_v62, %v1061_v7 }
  0x4a   : > { %v398_v2 = vsub.s32 %v395_v63, %v1061_v7  ;;  %v427_v7 = vld [vmem:[%s1116_s1 + $0x8] sm:$0xff] (!%p690_p7) }
  0xd0   : > { %v216_v17 = vpop.xlane.xlu0 %215 }
  0xd1   : > { %v224_v19 = vrot.slane %v216_v17, %v1064_v9  ;;  %v228_v20 = vrot.slane %v216_v17, %v227_v10  ;;  %v232_v21 = vrot.slane %v216_v17, %v231_v11  ;;  %v236_v22 = vrot.slane %v216_v17, %v235_v12 }
  0xd2   : > { %v240_v23 = vrot.slane %v216_v17, %v239_v13  ;;  %v244_v24 = vrot.slane %v216_v17, %v243_v14  ;;  %v248_v25 = vrot.slane %v216_v17, %v247_v15  ;;  %v252_v26 = vrot.slane %v216_v17, %v251_v16 }
  0xd3   : > { %v285_v27 = vcombine.low %v224_v19, %v228_v20  ;;  %v286_v28 = vcombine.low %v232_v21, %v236_v22  ;;  %v503_v19 = vld [vmem:[%s1117_s2] sm:$0xff] (!%p690_p7) }
  0xd4   : > { %v218_v29 = vpop.xlane.xlu0 %217  ;;  %v287_v30 = vcombine.low %v240_v23, %v244_v24  ;;  %v288_v31 = vcombine.low %v248_v25, %v252_v26 }
  0xd5   : > { %v295_v32 = vrot.slane %v285_v27, %v294_v18  ;;  %v302_v33 = vrot.slane %v286_v28, %v294_v18  ;;  %v256_v34 = vrot.slane %v218_v29, %v1064_v9  ;;  %v260_v35 = vrot.slane %v218_v29, %v227_v10 }
  0xd6   : > { %v309_v36 = vrot.slane %v287_v30, %v294_v18  ;;  %v316_v37 = vrot.slane %v288_v31, %v294_v18  ;;  %v264_v38 = vrot.slane %v218_v29, %v231_v11  ;;  %v268_v39 = vrot.slane %v218_v29, %v235_v12  ;;  %v212_v11 = vld [vmem:[#allocation2] sm:$0x1] }
  0xd7   : > { %v317_v40 = vcombine.low %v295_v32, %v302_v33  ;;  %v272_v41 = vrot.slane %v218_v29, %v239_v13  ;;  %v276_v42 = vrot.slane %v218_v29, %v243_v14  ;;  %v280_v43 = vrot.slane %v218_v29, %v247_v15 }
  0xd8   : > { %v318_v44 = vcombine.low %v309_v36, %v316_v37  ;;  %v284_v45 = vrot.slane %v218_v29, %v251_v16  ;;  %v334_v46 = vcombine.low %v256_v34, %v260_v35  ;;  %v335_v47 = vcombine.low %v264_v38, %v268_v39 }
  0xd9   : > { %v325_v48 = vrot.slane %v317_v40, %v294_v18  ;;  %v336_v49 = vcombine.low %v272_v41, %v276_v42  ;;  %v908_v14 = vmov (!%p690_p7), 0.0|0.0   ;;  %v715_v15 = vpack.c.bf16 (!%p690_p7), %v427_v7, %v426_v4 }
  0xda   : > { %v332_v50 = vrot.slane %v318_v44, %v294_v18  ;;  %v337_v51 = vcombine.low %v280_v43, %v284_v45  ;;  %v344_v52 = vrot.slane %v334_v46, %v294_v18  ;;  %v351_v53 = vrot.slane %v335_v47, %v294_v18  ;;  %714 = vmatprep.subr.bf16.mxu0 (!%p690_p7), %v908_v14 }
  0xdb   : > { %v358_v54 = vrot.slane %v336_v49, %v294_v18  ;;  %v910_v16 = vmov (!%p690_p7), 0.0   ;;  %716 = vmatpush3.bf16.msra.mxu0 (!%p690_p7), %v715_v15 }
  0xdc   : > { %v333_v55 = vcombine.low %v325_v48, %v332_v50  ;;  %v365_v56 = vrot.slane %v337_v51, %v294_v18  ;;  %v366_v57 = vcombine.low %v344_v52, %v351_v53  ;;  %706 = vmatprep.mubr.msk.f32.mxu0 (!%p690_p7), %vm909_vm3, %v910_v16  ;;  %709 = vmatprep.subr.mxu1 (!%p690_p7), %v910_v16 }
  0xdd   : > { %711 = vmatprep.mubr.msk.f32.mxu1 (!%p690_p7), %vm909_vm3, %v910_v16  ;;  %710 = vmatpush3.msra.mxu1 (!%p690_p7), %v503_v19 }
  0xde   : > { %384 = vperm.xlu1 %797, %v333_v55   ;;  %v367_v58 = vcombine.low %v358_v54, %v365_v56  ;;  %v374_v59 = vrot.slane %v366_v57, %v294_v18 }
  0xe0   : > { %v381_v60 = vrot.slane %v367_v58, %v294_v18 }
  0xe2   : > { %v382_v61 = vcombine.low %v374_v59, %v381_v60 }
  0xe4   : > { %387 = vperm.xlu1 %797, %v382_v61  }
 0x15d   : > { %v385_v0 = vpop.permute.xlu1 %384 }
 0x15e   : > { %v394_v5 = vrot.slane %v385_v0, %v393_v1 }
 0x163   : > { %v388_v3 = vpop.permute.xlu1 %387 }
 0x164   : > { %v399_v6 = vrot.slane %v388_v3, %v398_v2 }
 0x166   : > { %v401_v8 = vsel %vm400_vm1, %v399_v6, %v394_v5 }
 0x167   : > { %v408_v10 = vrot.slane %v401_v8, %v294_v18  ;;  %423 = sbr.rel (%p690_p7) target bundleno = 949 (0x3b5), region = 44 }
 0x169   : > { %v415_v12 = vrot.slane %v408_v10, %v294_v18 }
 0x16b   : > { %v417_v13 = vadd.f32 %v415_v12, %v212_v11 }
 0x16d   : > { %419 = vst.msk [vmem:[#allocation2] sm:$0x1] %vm418_vm2, %v417_v13 }
 0x174   : > { %v424_v17 = vld [vmem:[#allocation2] sm:$0x1] }
 0x175   : > { %v425_v18 = vmul.f32 0.001953125, %v424_v17 }
 0x177   : > { %707 = vmatmul.mubr.msk.f32.vlgmr.msra.gmra.mrb[0].mxu0 %vm428_vm4, %v425_v18 }
 0x24a   : > { %v498_v20 = vpop.f32.mrb[0].mxu0 }
 0x24b   : > { %v502_v21 = vmax.f32 %v498_v20, 0.0  ;;  %v708_v22 = vpop.f32.mrb[1].mxu0 }
 0x24d   : > { %712 = vmatmul.mubr.msk.f32.vlgmr.msra.gmra.mrb[0].mxu1 %vm504_vm5, %v502_v21 }
 0x320   : > { %v574_v23 = vpop.f32.mrb[0].mxu1 }
 0x321   : > { %v693_v24 = vmul.f32 -1.442695, %v574_v23  ;;  %v713_v25 = vpop.f32.mrb[1].mxu1 }
 0x323   : > { %799 = vpow2.f32 %v693_v24 }
 0x32d   : > { %v800_v26 = vpop.eup %799 }
 0x32e   : > { %v581_v27 = vadd.f32 1.0, %v800_v26 }
 0x330   : > { %801 = vrcp.f32 %v581_v27 }
 0x33a   : > { %v802_v28 = vpop.eup %801 }
 0x33b   : > { %v587_v29 = vrot.slane %v802_v28, %v1064_v9 }
 0x33d   : > { %589 = vbcast.lane.b32.xlu0 %v587_v29, 256 }
 0x341   : > { %593 = vbcast.lane.b32.xlu0 %v587_v29, 264 }
 0x3af   : > { %v590_v30 = vpop.permute.xlu0 %589 }
 0x3b0   : > { %596 = vst.msk [vmem:[%s1058_s23] sm:$0xff] %vm595_vm6, %v590_v30 }
 0x3b3   : > { %v594_v31 = vpop.permute.xlu0 %593 }
 0x3b4   : > { %597 = vst.msk [vmem:[%s1058_s23 + $0x8] sm:$0xff] %vm595_vm6, %v594_v31 }
 0x3b5 PF: > { %s16_s19 = sadd.s32 1, %s899_s19   ;;  %s1123_s12 = smov %s875_s13 }
 0x3b6   : > { %p13_p6 = scmp.ge.s32.totalorder %s16_s19, 10   ;;  %s1124_s13 = smov %s879_s14 }
 0x3b7   : > { %s1125_s14 = smov %s998_s5  ;;  %s1126_s15 = smov %s891_s17 }
 0x3b8   : > { %s1127_s16 = smov %s895_s18  ;;  %s1128_s17 = smov %s1131_s21 }
 0x3b9   : > { %s1129_s18 = smov %s1135_s22  ;;  %15 = sbr.rel (!%p13_p6) target bundleno = 5 (0x5), region = 80 }
 0x3c0   :  { %619 = vsyncpa [#allocation4], 1 }
 0x3c1   :  { %621 = vsyncpa [#allocation4 + $0x1], 1 }

</bundles_post_ra>
